<compile_context>
chip_gen: v7x
topology: tpu7x:2x2x1
jax: 0.10.0
libtpu: 0.0.40
codegen_flags: <defaults>
</compile_context>

<pallas_src>
import jax
import jax.numpy as jnp
from jax.experimental import pallas as pl
from jax.experimental.pallas import tpu as pltpu

LANES = 128
SUBLANES = 8
# 1024x128 f32 = 512 KiB per buffer; kernel 1 streams 3 arrays x 2 pipeline
# buffers ~ 3 MiB -> fits v5e's default 16 MiB scoped VMEM and v7x's 64 MiB VMEM
# without touching vmem_limit_bytes, while being large enough (~86% of HBM
# roofline on v6e) that per-grid-step overhead is negligible.
MAX_BLOCK_ROWS = 1024

# register_buffer values from __init__ (deterministic, in-script):
QUANTILES = jnp.array([0.25, 0.75], dtype=jnp.float32)
WEIGHTS = jnp.array([-1.5, 2.5], dtype=jnp.float32)


def _round_up(x, m):
    return (x + m - 1) // m * m


def _pick_block_rows(rows):
    r = _round_up(rows, SUBLANES)
    return r if r <= MAX_BLOCK_ROWS else MAX_BLOCK_ROWS


# ---------------------------------------------------------------------------
# Kernel 1: elementwise squared-error loss (cast to f32 inside the kernel so the
# wrapper never materializes f32 copies of the inputs in HBM)
# ---------------------------------------------------------------------------
def _sq_err_kernel(o_ref, t_ref, l_ref):
    d = o_ref[...].astype(jnp.float32) - t_ref[...].astype(jnp.float32)
    l_ref[...] = d * d


def squared_error_loss(o2d, t2d, block_rows):
    rows, cols = o2d.shape
    assert cols == LANES and rows % block_rows == 0
    grid = (rows // block_rows,)
    return pl.pallas_call(
        _sq_err_kernel,
        out_shape=jax.ShapeDtypeStruct((rows, cols), jnp.float32),
        grid_spec=pltpu.PrefetchScalarGridSpec(
            num_scalar_prefetch=0,
            grid=grid,
            in_specs=[
                pl.BlockSpec((block_rows, LANES), lambda i: (i, 0)),
                pl.BlockSpec((block_rows, LANES), lambda i: (i, 0)),
            ],
            out_specs=pl.BlockSpec((block_rows, LANES), lambda i: (i, 0)),
        ),
        compiler_params=pltpu.CompilerParams(
            dimension_semantics=("parallel",)
        ),
    )(o2d, t2d)


# ---------------------------------------------------------------------------
# Kernel 2: masked partial reduction.  Each grid block produces one lane-dense
# (8, 128) partial sum and partial count (pure VPU adds in the hot loop, single
# lane-dense store per block — no per-step XLU cross-lane reduce, no masked
# (1,1) stores).  The grid is fully parallel, so on v7x both TensorCores
# participate; the tiny final reduce over partials happens in plain JAX.
# ---------------------------------------------------------------------------
def _masked_partial_kernel(thr_ref, loss_ref, sum_ref, cnt_ref):
    thr = thr_ref[0]                      # read scalar once from SMEM
    l = loss_ref[...]                     # (block_rows, 128) f32
    mask = l < thr
    masked = jnp.where(mask, l, 0.0)
    cnt = mask.astype(jnp.float32)
    sub = loss_ref.shape[0] // SUBLANES   # reshape stays within (8,128) tiles
    sum_ref[...] = jnp.sum(masked.reshape(sub, SUBLANES, LANES), axis=0)
    cnt_ref[...] = jnp.sum(cnt.reshape(sub, SUBLANES, LANES), axis=0)


def masked_sum_count(loss2d, thr_scalar, block_rows):
    rows, cols = loss2d.shape
    assert cols == LANES and rows % block_rows == 0
    grid_n = rows // block_rows
    thr = jnp.reshape(thr_scalar.astype(jnp.float32), (1,))
    sums, cnts = pl.pallas_call(
        _masked_partial_kernel,
        out_shape=(
            jax.ShapeDtypeStruct((grid_n * SUBLANES, LANES), jnp.float32),
            jax.ShapeDtypeStruct((grid_n * SUBLANES, LANES), jnp.float32),
        ),
        grid_spec=pltpu.PrefetchScalarGridSpec(
            num_scalar_prefetch=1,                 # thr -> SMEM
            grid=(grid_n,),
            in_specs=[
                pl.BlockSpec((block_rows, LANES), lambda i, _thr: (i, 0)),
            ],
            out_specs=(
                pl.BlockSpec((SUBLANES, LANES), lambda i, _thr: (i, 0)),
                pl.BlockSpec((SUBLANES, LANES), lambda i, _thr: (i, 0)),
            ),
        ),
        compiler_params=pltpu.CompilerParams(
            dimension_semantics=("parallel",)
        ),
    )(thr, loss2d)
    # Final reduce over the small lane-dense partials (f32, numerically stable
    # vs. repeated scalar accumulation).
    return jnp.sum(sums), jnp.sum(cnts)


# ---------------------------------------------------------------------------
# LossIQR forward
# ---------------------------------------------------------------------------
def loss_iqr_forward(outputs, targets):
    """outputs/targets: NCHW arrays. Returns (mean of masked losses, mask fraction)."""
    n = outputs.size
    o_flat = outputs.reshape(-1)
    t_flat = targets.reshape(-1)

    rows = -(-n // LANES)
    block_rows = _pick_block_rows(rows)
    padded_rows = _round_up(rows, block_rows)
    pad = padded_rows * LANES - n
    if pad:
        # padded loss = (+inf - 0)^2 = +inf: excluded by `< thr`, sliced off
        # before the quantile.
        o_flat = jnp.pad(o_flat, (0, pad), constant_values=jnp.inf)
        t_flat = jnp.pad(t_flat, (0, pad), constant_values=0)

    o2d = o_flat.reshape(padded_rows, LANES)
    t2d = t_flat.reshape(padded_rows, LANES)

    # elementwise loss (Pallas, f32 output)
    loss2d = squared_error_loss(o2d, t2d, block_rows)

    # TODO(synk): torch.quantile needs a sort/selection; the XLA sort here is the
    # dominant HBM cost end-to-end.  A fused Pallas histogram-based selection
    # could replace it, but only by relaxing exact torch-parity interpolation.
    loss_valid = loss2d.reshape(-1)[:n]
    q = jnp.quantile(loss_valid, QUANTILES, method="linear")
    thr = jnp.sum(q * WEIGHTS)

    # masked reduction (Pallas partials + tiny JAX finish)
    s, c = masked_sum_count(loss2d, thr, block_rows)

    # NOTE: if no element satisfies loss < thr (c == 0) this yields NaN, matching
    # torch.mean over an empty selection.
    return s / c, c / jnp.float32(n)


# ---------------------------------------------------------------------------
if __name__ == "__main__":
    key = jax.random.PRNGKey(0)
    k1, k2 = jax.random.split(key)
    # Small NCHW shapes consistent with a conv-style loss input.
    x_shape = (2, 4, 16, 16)
    outputs = jax.random.normal(k1, x_shape, dtype=jnp.float32)
    targets = jax.random.normal(k2, x_shape, dtype=jnp.float32)

    result, frac = loss_iqr_forward(outputs, targets)
    jax.block_until_ready(result)
    jax.block_until_ready(frac)

    # Pure-JAX reference (same semantics as the PyTorch module).
    loss_ref = (outputs - targets) ** 2
    q_ref = jnp.quantile(loss_ref.reshape(-1), QUANTILES, method="linear")
    thr_ref = jnp.sum(q_ref * WEIGHTS)
    mask_ref = loss_ref < thr_ref
    ref = jnp.sum(jnp.where(mask_ref, loss_ref, 0.0)) / jnp.sum(mask_ref)
    frac_ref = jnp.sum(mask_ref) / loss_ref.size
    assert jnp.allclose(result, ref, rtol=1e-5, atol=1e-6), (result, ref)
    assert jnp.allclose(frac, frac_ref, rtol=1e-5, atol=1e-6), (frac, frac_ref)

    print("KERNEL_OK")
</pallas_src>

<mosaic_0001>
module attributes {stable_mosaic.version = 11 : i64} {
  func.func @_sq_err_kernel(%arg0: i32, %arg1: memref<16x128xf32, #tpu.memory_space<vmem>>, %arg2: memref<16x128xf32, #tpu.memory_space<vmem>>, %arg3: memref<16x128xf32, #tpu.memory_space<vmem>>) attributes {dimension_semantics = [#tpu.dimension_semantics<parallel>], iteration_bounds = array<i64: 1>, scalar_prefetch = 0 : i64, scratch_operands = 0 : i64, tpu.core_type = #tpu.core_type<tc>, window_params = [{transform_indices = @transform_0, window_bounds = array<i64: 16, 128>}, {transform_indices = @transform_1, window_bounds = array<i64: 16, 128>}, {transform_indices = @transform_2, window_bounds = array<i64: 16, 128>}]} {
    %c0 = arith.constant 0 : index
    %c0_0 = arith.constant 0 : index
    %0 = vector.load %arg1[%c0, %c0_0] : memref<16x128xf32, #tpu.memory_space<vmem>>, vector<16x128xf32>
    %c0_1 = arith.constant 0 : index
    %c0_2 = arith.constant 0 : index
    %1 = vector.load %arg2[%c0_1, %c0_2] : memref<16x128xf32, #tpu.memory_space<vmem>>, vector<16x128xf32>
    %2 = arith.subf %0, %1 : vector<16x128xf32>
    %3 = arith.mulf %2, %2 : vector<16x128xf32>
    %c0_3 = arith.constant 0 : index
    %c0_4 = arith.constant 0 : index
    %4 = vector.load %arg3[%c0_3, %c0_4] : memref<16x128xf32, #tpu.memory_space<vmem>>, vector<16x128xf32>
    tpu.vector_store %arg3[%c0_3, %c0_4], %3 {strides = array<i32>} : memref<16x128xf32, #tpu.memory_space<vmem>>, vector<16x128xf32>,
    return
  }
  func.func @transform_0(%arg0: i32) -> (i32, i32) {
    %c0_i32 = arith.constant 0 : i32
    %c0_i32_0 = arith.constant 0 : i32
    return %arg0, %c0_i32 : i32, i32
  }
  func.func @transform_1(%arg0: i32) -> (i32, i32) {
    %c0_i32 = arith.constant 0 : i32
    %c0_i32_0 = arith.constant 0 : i32
    return %arg0, %c0_i32 : i32, i32
  }
  func.func @transform_2(%arg0: i32) -> (i32, i32) {
    %c0_i32 = arith.constant 0 : i32
    %c0_i32_0 = arith.constant 0 : i32
    return %arg0, %c0_i32 : i32, i32
  }
}

</mosaic_0001>

<bundles_post_ra>
// kernel: tpu_custom_call.1
= control target key start
LH: loop header
LB: loop body
LE: loop exit
PB: predicated region body
PF: predicated region fallthrough
CT: control target
= control target key end

     0   :  { %7 = vsyncpa [#allocation3], 0  ;;  %s210_s0 = inlined_call_operand.hbm [shape: f32[16,128], index: 0, kind: input, shape index: {}]   ;;  %s211_s1 = inlined_call_operand.hbm [shape: f32[16,128], index: 1, kind: input, shape index: {}]   ;;  %s212_s2 = inlined_call_operand.hbm [shape: f32[16,128], index: 2, kind: output, shape index: {}]  }
   0x1   :  { %8 = vsyncpa [#allocation6], 0 }
   0x2   :  { %9 = vsyncpa [#allocation4], 0  ;;  %s145_s9 = smov [#allocation2]   ;;  %s73_s13 = scalar_lea.hbm %s210_s0, 256 }
   0x3   :  { %s15_s10 = sshll.u32 %s145_s9, 4  ;;  %p74_p0 = scmp.ne.s32.totalorder %s210_s0, %s73_s13  ;;  %s16_s10 = int_to_ptr.vmem [resolvable:$true] %s15_s10 }
   0x4   :  { %p77_p1 = scmp.lt.u32.totalorder %s73_s13, %s210_s0 }
   0x6   :  { %p79_p2 = pnand %p77_p1, %p74_p0 }
   0x8   :  { %82 = shalt.err (!%p79_p2)
}
   0x9   :  { %s83_s18 = scalar_lea.vmem %s16_s10, 256  ;;  %p88_p4 = scmp.lt.s32.totalorder %s16_s10, %s16_s10 }
   0xa   :  { %p84_p3 = scmp.ne.s32.totalorder %s16_s10, %s83_s18  ;;  %p89_p5 = scmp.lt.s32.totalorder %s83_s18, %s83_s18 }
   0xc   :  { %p90_p6 = por %p89_p5, %p88_p4 }
   0xe   :  { %p91_p7 = pnand %p90_p6, %p84_p3 }
  0x10   :  { %94 = shalt.err (!%p91_p7)
}
  0x11   :  { %s146_s19 = smov 128   ;;  %s147_s20 = smov 8  }
  0x12   :  { %21 = dma.hbm_to_vmem [thread:$0]  %s210_s0, 256, %s16_s10, [#allocation3], %s146_s19, %s146_s19, %s147_s20  }
  0x13   :  { %s148_s23 = smov [#allocation5]   ;;  %s95_s27 = scalar_lea.hbm %s211_s1, 256 }
  0x14   :  { %s27_s24 = sshll.u32 %s148_s23, 4  ;;  %p96_p8 = scmp.ne.s32.totalorder %s211_s1, %s95_s27  ;;  %s28_s24 = int_to_ptr.vmem [resolvable:$true] %s27_s24 }
  0x15   :  { %p99_p9 = scmp.lt.u32.totalorder %s95_s27, %s211_s1 }
  0x17   :  { %p101_p10 = pnand %p99_p9, %p96_p8 }
  0x19   :  { %104 = shalt.err (!%p101_p10)
}
  0x1a   :  { %s105_s4 = scalar_lea.vmem %s28_s24, 256  ;;  %p110_p12 = scmp.lt.s32.totalorder %s28_s24, %s28_s24 }
  0x1b   :  { %p106_p11 = scmp.ne.s32.totalorder %s28_s24, %s105_s4  ;;  %p111_p13 = scmp.lt.s32.totalorder %s105_s4, %s105_s4 }
  0x1d   :  { %p112_p0 = por %p111_p13, %p110_p12 }
  0x1f   :  { %p113_p1 = pnand %p112_p0, %p106_p11 }
  0x21   :  { %116 = shalt.err (!%p113_p1)
}
  0x22   :  { %33 = dma.hbm_to_vmem [thread:$0]  %s211_s1, 256, %s28_s24, [#allocation6], %s146_s19, %s146_s19, %s147_s20  }
  0x23   :  { %139 = dma.done.wait [#allocation3], 256  }
  0x24   :  { %140 = vsyncadd [#allocation3], 4294967040 }
  0x25   :  { %141 = dma.done.wait [#allocation6], 256  }
  0x26   :  { %142 = vsyncadd [#allocation6], 4294967040  ;;  %v40_v0 = vld [vmem:[#allocation2] sm:$0xff]  ;;  %v42_v1 = vld [vmem:[#allocation5] sm:$0xff]  ;;  %s149_s6 = smov [#allocation7]  }
  0x27   :  { %v41_v2 = vld [vmem:[#allocation2 + $0x8] sm:$0xff]  ;;  %v44_v3 = vsub.f32 %v40_v0, %v42_v1  ;;  %v43_v4 = vld [vmem:[#allocation5 + $0x8] sm:$0xff]  ;;  %s55_s7 = sshll.u32 %s149_s6, 4  ;;  %s56_s7 = int_to_ptr.vmem [resolvable:$true] %s55_s7 }
  0x28   :  { %v45_v5 = vsub.f32 %v41_v2, %v43_v4  ;;  %s117_s8 = scalar_lea.vmem %s56_s7, 256  ;;  %p122_p3 = scmp.lt.s32.totalorder %s56_s7, %s56_s7 }
  0x29   :  { %v46_v6 = vmul.f32 %v44_v3, %v44_v3  ;;  %p118_p2 = scmp.ne.s32.totalorder %s56_s7, %s117_s8  ;;  %p123_p4 = scmp.lt.s32.totalorder %s117_s8, %s117_s8 }
  0x2a   :  { %v47_v7 = vmul.f32 %v45_v5, %v45_v5 }
  0x2b   :  { %48 = vst [vmem:[#allocation7] sm:$0xff] %v46_v6  ;;  %p124_p5 = por %p123_p4, %p122_p3 }
  0x2c   :  { %49 = vst [vmem:[#allocation7 + $0x8] sm:$0xff] %v47_v7 }
  0x2d   :  { %p125_p6 = pnand %p124_p5, %p118_p2 }
  0x2f   :  { %128 = shalt.err (!%p125_p6)
}
  0x30   :  { %s129_s10 = scalar_lea.hbm %s212_s2, 256 }
  0x31   :  { %p130_p7 = scmp.ne.s32.totalorder %s212_s2, %s129_s10  ;;  %p133_p8 = scmp.lt.u32.totalorder %s129_s10, %s212_s2 }
  0x33   :  { %p135_p9 = pnand %p133_p8, %p130_p7 }
  0x35   :  { %138 = shalt.err (!%p135_p9)
}
  0x36   :  { %61 = dma.vmem_to_hbm [thread:$0]  %s56_s7, 256, %s212_s2, [#allocation4], %s146_s19, %s146_s19, %s147_s20  }
  0x37   :  { %143 = dma.done.wait [#allocation4], 256  }
  0x38   :  { %144 = vsyncadd [#allocation4], 4294967040 }
  0x39   :  { %65 = vsyncpa [#allocation3], 1 }
  0x3a   :  { %66 = vsyncpa [#allocation6], 1 }
  0x3b   :  { %67 = vsyncpa [#allocation4], 1 }

</bundles_post_ra>
